<compile_context>
chip_gen: v6e
topology: v6e:2x2x1
jax: 0.10.0
libtpu: 0.0.40
codegen_flags: <defaults>
</compile_context>

<pallas_src>
from functools import partial
from typing import Optional

import jax
import jax.numpy as jnp
from jax.experimental import pallas as pl
from jax.experimental.pallas import tpu as pltpu


def _pre_encoded_kernel(*refs, Dc: int, Dk: int, batch_norm: bool,
                        dropout_rate: float):
    refs = list(refs)
    out_ref = refs.pop()
    it = iter(refs)
    cont_ref = next(it) if Dc > 0 else None
    cat_ref = next(it) if Dk > 0 else None
    scale_ref = shift_ref = None
    if batch_norm and Dc > 0:
        scale_ref = next(it)
        shift_ref = next(it)
    u_ref = next(it) if dropout_rate > 0.0 else None

    if dropout_rate > 0.0:
        u = u_ref[...]
        thresh = jnp.float32(dropout_rate)
        keep_scale = jnp.float32(1.0 / (1.0 - dropout_rate))

    if Dc > 0:
        if batch_norm:
            # Pre-folded affine: x * (gamma*inv_std) + (beta - mean*gamma*inv_std)
            cont = cont_ref[...].astype(jnp.float32) * scale_ref[...] + shift_ref[...]
        else:
            cont = cont_ref[...]          # native dtype pass-through
        if dropout_rate > 0.0:
            cont = jnp.where(u[:, :Dc] >= thresh,
                             cont.astype(jnp.float32) * keep_scale,
                             jnp.float32(0.0))
        if Dk > 0:
            out_ref[:, :Dc] = cont.astype(out_ref.dtype)
        else:
            out_ref[...] = cont.astype(out_ref.dtype)

    if Dk > 0:
        cat = cat_ref[...]                # native dtype pass-through
        if dropout_rate > 0.0:
            cat = jnp.where(u[:, Dc:] >= thresh,
                            cat.astype(jnp.float32) * keep_scale,
                            jnp.float32(0.0))
        if Dc > 0:
            out_ref[:, Dc:] = cat.astype(out_ref.dtype)
        else:
            out_ref[...] = cat.astype(out_ref.dtype)


def _choose_batch_tile(B: int, per_row_bytes: int,
                       vmem_budget_bytes: int = 8 << 20,
                       max_tile: int = 1024) -> int:
    """Largest multiple-of-8 row tile whose double-buffered streams fit the budget."""
    if B <= 8:
        return B
    rows = max(8, vmem_budget_bytes // (2 * max(per_row_bytes, 1)))
    tb = min(B, rows, max_tile)
    return max(8, (tb // 8) * 8)


def pre_encoded_1d_layer(continuous, categorical, gamma=None, beta=None, *,
                         batch_norm_continuous_input: bool = False,
                         embedding_dropout: float = 0.0,
                         dropout_seed: int = 0,
                         eps: float = 1e-5,
                         batch_tile: Optional[int] = None,
                         allow_fast_path: bool = True):
    """Pallas implementation of PreEncoded1dLayer.forward.

    continuous : (B, Dc) float (Dc may be 0)
    categorical: (B, Dk) float pre-encoded categoricals (Dk may be 0)
    gamma, beta: (Dc,) BatchNorm affine params (default 1 / 0 if None)
    returns    : (B, Dc + Dk)
    """
    Bc, Dc = continuous.shape
    Bk, Dk = categorical.shape
    assert Dc + Dk > 0, "x must contain either continuous or categorical features"
    if Dc > 0 and Dk > 0:
        assert Bc == Bk, "batch dims must match"
    B = Bc if Dc > 0 else Bk
    Dout = Dc + Dk

    if Dc > 0 and Dk > 0:
        out_dtype = jnp.result_type(continuous.dtype, categorical.dtype)
    elif Dc > 0:
        out_dtype = continuous.dtype
    else:
        out_dtype = categorical.dtype

    bn = bool(batch_norm_continuous_input) and Dc > 0
    p = float(embedding_dropout)

    # Default config is a pure concat -> let XLA's fused copy do it (zero-cost win).
    if allow_fast_path and not bn and p == 0.0:
        if Dc == 0:
            return categorical.astype(out_dtype)
        if Dk == 0:
            return continuous.astype(out_dtype)
        return jnp.concatenate(
            [continuous.astype(out_dtype), categorical.astype(out_dtype)], axis=1)

    # --- pick batch tile (memory-bound: biggest tile that fits comfortably) ---
    per_row_bytes = Dout * jnp.dtype(out_dtype).itemsize
    if Dc > 0:
        per_row_bytes += Dc * continuous.dtype.itemsize
    if Dk > 0:
        per_row_bytes += Dk * categorical.dtype.itemsize
    if p > 0.0:
        per_row_bytes += Dout * 4  # uniform randoms stream
    TB = batch_tile if batch_tile is not None else _choose_batch_tile(B, per_row_bytes)
    TB = max(1, min(TB, B))
    grid = (pl.cdiv(B, TB),)

    # --- build inputs / specs ---
    inputs = []
    in_specs = []
    if Dc > 0:
        inputs.append(continuous)
        in_specs.append(pl.BlockSpec((TB, Dc), lambda i: (i, 0)))
    if Dk > 0:
        inputs.append(categorical)
        in_specs.append(pl.BlockSpec((TB, Dk), lambda i: (i, 0)))

    if bn:
        # BatchNorm1d training-mode stats, hoisted out of the kernel (tiny XLA
        # reduce) and folded into per-feature scale / shift so batch tiles are
        # fully independent.
        cont_f32 = continuous.astype(jnp.float32)
        mean = jnp.mean(cont_f32, axis=0)
        var = jnp.mean(jnp.square(cont_f32 - mean[None, :]), axis=0)  # biased
        inv_std = jax.lax.rsqrt(var + jnp.float32(eps))
        g = jnp.ones((Dc,), jnp.float32) if gamma is None else gamma.astype(jnp.float32)
        b = jnp.zeros((Dc,), jnp.float32) if beta is None else beta.astype(jnp.float32)
        scale = (g * inv_std).reshape(1, Dc)
        shift = (b - mean * g * inv_std).reshape(1, Dc)
        inputs += [scale, shift]
        in_specs += [pl.BlockSpec((1, Dc), lambda i: (0, 0)),
                     pl.BlockSpec((1, Dc), lambda i: (0, 0))]

    if p > 0.0:
        # Per-tile distinct randoms come for free from the batch-tiled BlockSpec.
        # TODO(synk): cannot bit-match torch's RNG stream; distribution/scaling match.
        u = jax.random.uniform(jax.random.PRNGKey(dropout_seed), (B, Dout),
                               dtype=jnp.float32)
        inputs.append(u)
        in_specs.append(pl.BlockSpec((TB, Dout), lambda i: (i, 0)))

    kernel = partial(_pre_encoded_kernel, Dc=Dc, Dk=Dk, batch_norm=bn,
                     dropout_rate=p)

    return pl.pallas_call(
        kernel,
        out_shape=jax.ShapeDtypeStruct((B, Dout), out_dtype),
        grid=grid,
        in_specs=in_specs,
        out_specs=pl.BlockSpec((TB, Dout), lambda i: (i, 0)),
        compiler_params=pltpu.CompilerParams(
            dimension_semantics=("parallel",),
            vmem_limit_bytes=32 * 1024 * 1024),
    )(*inputs)


def _reference_forward(cont, cat, gamma, beta, batch_norm, eps=1e-5):
    """Pure-JAX reference mirroring the PyTorch module (dropout handled by caller)."""
    embed = cont
    if batch_norm:
        mean = cont.mean(axis=0, keepdims=True)
        var = ((cont - mean) ** 2).mean(axis=0, keepdims=True)
        embed = (cont - mean) / jnp.sqrt(var + eps) * gamma[None, :] + beta[None, :]
    return jnp.concatenate([embed, cat], axis=1)


if __name__ == "__main__":
    key = jax.random.PRNGKey(0)
    k1, k2, k3, k4 = jax.random.split(key, 4)

    B, Dc, Dk = 8, 6, 10  # small shapes: batch=8, continuous_dim=6, categorical_dim=10
    continuous = jax.random.normal(k1, (B, Dc), dtype=jnp.float32)
    categorical = jax.random.normal(k2, (B, Dk), dtype=jnp.float32)

    # PyTorch BatchNorm1d default init: weight=1, bias=0.
    gamma = jnp.ones((Dc,), dtype=jnp.float32)
    beta = jnp.zeros((Dc,), dtype=jnp.float32)

    # Case 1: plain concat through the Pallas kernel (fast path disabled).
    out_plain = pre_encoded_1d_layer(
        continuous, categorical, gamma, beta, allow_fast_path=False)
    jax.block_until_ready(out_plain)
    ref_plain = _reference_forward(continuous, categorical, gamma, beta, False)
    assert out_plain.shape == (B, Dc + Dk)
    assert jnp.allclose(out_plain, ref_plain, atol=1e-6, rtol=1e-6)

    # Case 1b: default config takes the XLA fast path — identical result.
    out_fast = pre_encoded_1d_layer(continuous, categorical, gamma, beta)
    jax.block_until_ready(out_fast)
    assert jnp.allclose(out_fast, ref_plain, atol=1e-6, rtol=1e-6)

    # Case 2: batch_norm_continuous_input=True, multi-tile batch grid (48 / 16 = 3 tiles).
    B2 = 48
    cont2 = jax.random.normal(k3, (B2, Dc), dtype=jnp.float32)
    cat2 = jax.random.normal(k4, (B2, Dk), dtype=jnp.float32)
    out_bn = pre_encoded_1d_layer(
        cont2, cat2, gamma, beta,
        batch_norm_continuous_input=True, batch_tile=16)
    jax.block_until_ready(out_bn)
    ref_bn = _reference_forward(cont2, cat2, gamma, beta, True)
    assert jnp.allclose(out_bn, ref_bn, atol=1e-4, rtol=1e-4)

    # Case 3: embedding_dropout > 0 — exact match against the same uniform stream.
    p, seed = 0.25, 123
    out_do = pre_encoded_1d_layer(
        continuous, categorical, gamma, beta,
        batch_norm_continuous_input=True, embedding_dropout=p, dropout_seed=seed)
    jax.block_until_ready(out_do)
    ref_bn_small = _reference_forward(continuous, categorical, gamma, beta, True)
    u = jax.random.uniform(jax.random.PRNGKey(seed), (B, Dc + Dk), dtype=jnp.float32)
    ref_do = jnp.where(u >= p, ref_bn_small / (1.0 - p), 0.0)
    assert jnp.allclose(out_do, ref_do, atol=1e-4, rtol=1e-4)

    print("KERNEL_OK")
</pallas_src>

<mosaic_0001>
module attributes {stable_mosaic.version = 11 : i64} {
  func.func @_pre_encoded_kernel(%arg0: i32, %arg1: memref<8x6xf32, #tpu.memory_space<vmem>>, %arg2: memref<8x10xf32, #tpu.memory_space<vmem>>, %arg3: memref<8x16xf32, #tpu.memory_space<vmem>>) attributes {dimension_semantics = [#tpu.dimension_semantics<parallel>], iteration_bounds = array<i64: 1>, scalar_prefetch = 0 : i64, scratch_operands = 0 : i64, tpu.core_type = #tpu.core_type<tc>, window_params = [{transform_indices = @transform_0, window_bounds = array<i64: 8, 6>}, {transform_indices = @transform_1, window_bounds = array<i64: 8, 10>}, {transform_indices = @transform_2, window_bounds = array<i64: 8, 16>}]} {
    %c0 = arith.constant 0 : index
    %c0_0 = arith.constant 0 : index
    %0 = vector.load %arg1[%c0, %c0_0] : memref<8x6xf32, #tpu.memory_space<vmem>>, vector<8x6xf32>
    %c0_1 = arith.constant 0 : index
    %c0_2 = arith.constant 0 : index
    %1 = vector.load %arg3[%c0_1, %c0_2] : memref<8x16xf32, #tpu.memory_space<vmem>>, vector<8x6xf32>
    tpu.vector_store %arg3[%c0_1, %c0_2], %0 {strides = array<i32>} : memref<8x16xf32, #tpu.memory_space<vmem>>, vector<8x6xf32>,
    %c0_3 = arith.constant 0 : index
    %c0_4 = arith.constant 0 : index
    %2 = vector.load %arg2[%c0_3, %c0_4] : memref<8x10xf32, #tpu.memory_space<vmem>>, vector<8x10xf32>
    %c0_5 = arith.constant 0 : index
    %c6 = arith.constant 6 : index
    %3 = vector.load %arg3[%c0_5, %c6] : memref<8x16xf32, #tpu.memory_space<vmem>>, vector<8x10xf32>
    tpu.vector_store %arg3[%c0_5, %c6], %2 {strides = array<i32>} : memref<8x16xf32, #tpu.memory_space<vmem>>, vector<8x10xf32>,
    return
  }
  func.func @transform_0(%arg0: i32) -> (i32, i32) {
    %c0_i32 = arith.constant 0 : i32
    %c0_i32_0 = arith.constant 0 : i32
    return %arg0, %c0_i32 : i32, i32
  }
  func.func @transform_1(%arg0: i32) -> (i32, i32) {
    %c0_i32 = arith.constant 0 : i32
    %c0_i32_0 = arith.constant 0 : i32
    return %arg0, %c0_i32 : i32, i32
  }
  func.func @transform_2(%arg0: i32) -> (i32, i32) {
    %c0_i32 = arith.constant 0 : i32
    %c0_i32_0 = arith.constant 0 : i32
    return %arg0, %c0_i32 : i32, i32
  }
}

</mosaic_0001>

<bundles_post_ra>
// kernel: tpu_custom_call.1
= control target key start
LH: loop header
LB: loop body
LE: loop exit
PB: predicated region body
PF: predicated region fallthrough
CT: control target
= control target key end

     0   :  { %7 = vsyncpa [#allocation3], 0  ;;  %s160_s0 = inlined_call_operand.hbm [shape: f32[8,6], index: 0, kind: input, shape index: {}]   ;;  %s161_s1 = inlined_call_operand.hbm [shape: f32[8,10], index: 1, kind: input, shape index: {}]   ;;  %s162_s2 = inlined_call_operand.hbm [shape: f32[8,16], index: 2, kind: output, shape index: {}]  }
   0x1   :  { %8 = vsyncpa [#allocation6], 0 }
   0x2   :  { %9 = vsyncpa [#allocation4], 0  ;;  %s132_s9 = smov [#allocation2]   ;;  %s133_s11 = smov [#allocation5]  }
   0x3   :  { %s16_s10 = sshll.u32 %s132_s9, 4  ;;  %s26_s12 = sshll.u32 %s133_s11, 4  ;;  %s17_s10 = int_to_ptr.vmem [resolvable:$true] %s16_s10  ;;  %s27_s12 = int_to_ptr.vmem [resolvable:$true] %s26_s12 }
   0x4   :  { %s74_s13 = scalar_lea.vmem %s17_s10, 128  ;;  %p79_p1 = scmp.lt.s32.totalorder %s17_s10, %s17_s10 }
   0x5   :  { %p75_p0 = scmp.ne.s32.totalorder %s17_s10, %s74_s13  ;;  %p80_p2 = scmp.lt.s32.totalorder %s74_s13, %s74_s13 }
   0x7   :  { %p81_p3 = por %p80_p2, %p79_p1 }
   0x9   :  { %p82_p4 = pnand %p81_p3, %p75_p0 }
   0xb   :  { %85 = shalt.err (!%p82_p4)
}
   0xc   :  { %19 = dma.hbm_to_vmem [thread:$0]  %s160_s0, 128, %s17_s10, [#allocation3]  }
   0xd   :  { %s94_s16 = scalar_lea.vmem %s27_s12, 128  ;;  %p99_p6 = scmp.lt.s32.totalorder %s27_s12, %s27_s12 }
   0xe   :  { %p95_p5 = scmp.ne.s32.totalorder %s27_s12, %s94_s16  ;;  %p100_p7 = scmp.lt.s32.totalorder %s94_s16, %s94_s16 }
  0x10   :  { %p101_p8 = por %p100_p7, %p99_p6 }
  0x12   :  { %p102_p9 = pnand %p101_p8, %p95_p5 }
  0x14   :  { %105 = shalt.err (!%p102_p9)
}
  0x15   :  { %29 = dma.hbm_to_vmem [thread:$0]  %s161_s1, 128, %s27_s12, [#allocation6]  }
  0x16   :  { %126 = dma.done.wait [#allocation3], 128  }
  0x17   :  { %127 = vsyncadd [#allocation3], 4294967168 }
  0x18   :  { %128 = dma.done.wait [#allocation6], 128  }
  0x19   :  { %129 = vsyncadd [#allocation6], 4294967168  ;;  %vm37_vm0 = vcmask 48128   ;;  %v39_v0 = vld [vmem:[#allocation5] sm:$0xff]  ;;  %v36_v1 = vld [vmem:[#allocation2] sm:$0xff]  ;;  %s134_s19 = smov 6  }
  0x1a   :  { %41 = vrot.lane.b32.xlu0 %v39_v0, %s134_s19  ;;  %38 = vst.msk [vmem:[#allocation7] sm:$0xff] %vm37_vm0, %v36_v1  ;;  %s135_s0 = smov [#allocation7]   ;;  %vm44_vm1 = vcmask 130096  }
  0x1b   :  { %s52_s20 = sshll.u32 %s135_s0, 4  ;;  %s53_s20 = int_to_ptr.vmem [resolvable:$true] %s52_s20 }
  0x1c   :  { %s106_s21 = scalar_lea.vmem %s53_s20, 128  ;;  %p111_p11 = scmp.lt.s32.totalorder %s53_s20, %s53_s20 }
  0x1d   :  { %p107_p10 = scmp.ne.s32.totalorder %s53_s20, %s106_s21  ;;  %p112_p12 = scmp.lt.s32.totalorder %s106_s21, %s106_s21 }
  0x1f   :  { %p113_p13 = por %p112_p12, %p111_p11 }
  0x21   :  { %p114_p0 = pnand %p113_p13, %p107_p10 }
  0x8c   :  { %v42_v2 = vpop.permute.xlu0 %41 }
  0x8d   :  { %45 = vst.msk [vmem:[#allocation7] sm:$0xff] %vm44_vm1, %v42_v2 }
  0x8e   :  { %117 = shalt.err (!%p114_p0)
}
  0x8f   :  { %55 = dma.vmem_to_hbm [thread:$0]  %s53_s20, 128, %s162_s2, [#allocation4]  }
  0x90   :  { %130 = dma.done.wait [#allocation4], 128  }
  0x91   :  { %131 = vsyncadd [#allocation4], 4294967168 }
  0x92   :  { %59 = vsyncpa [#allocation3], 1 }
  0x93   :  { %60 = vsyncpa [#allocation6], 1 }
  0x94   :  { %61 = vsyncpa [#allocation4], 1 }

</bundles_post_ra>
